<compile_context>
chip_gen: v7x
topology: tpu7x:2x2x1
jax: 0.10.0
libtpu: 0.0.40
codegen_flags: <defaults>
</compile_context>

<pallas_src>
import functools

import jax
import jax.numpy as jnp
from jax.experimental import pallas as pl
from jax.experimental.pallas import tpu as pltpu

_NEG_BIG = -1e30   # logit padding value for non-existent (padded) classes


def _round_up(x, m):
    return -(-x // m) * m


def _loss_meta_kernel(cv_l_ref, n2fc_ref, fcT_ref, y_ref, t3_ref, ylab_ref,
                      wn_ref, lab_ref, out_ref, m_sc, l_sc, *, ratio, block_c):
    ci = pl.program_id(1)
    nc = pl.num_programs(1)

    @pl.when(ci == 0)
    def _init():
        m_sc[...] = jnp.full_like(m_sc, -jnp.inf)
        l_sc[...] = jnp.zeros_like(l_sc)

    # sigma2[n, c] = ratio * sum_a (fc[c,a] - fc[l_n,a])^2 * cv[l_n,a]
    #             = ratio * ( cv_l @ (fc^2)^T - 2 (fc_l*cv_l) @ fc^T + term3[n] )
    fcT = fcT_ref[...]                                              # (Ap, tc)
    quad = jnp.dot(cv_l_ref[...], fcT * fcT, preferred_element_type=jnp.float32)
    quad = quad + jnp.dot(n2fc_ref[...], fcT, preferred_element_type=jnp.float32)
    sigma2 = ratio * (quad + t3_ref[...])                           # (tn, tc)

    # Label column is analytically zero (fc_l == fc[label]); enforce it exactly.
    tn, tc = sigma2.shape
    cols = ci * block_c + jax.lax.broadcasted_iota(jnp.int32, (tn, tc), 1)
    sigma2 = jnp.where(cols == lab_ref[...], 0.0, sigma2)

    aug = y_ref[...] + 0.5 * sigma2                                 # (tn, tc)

    # Online softmax accumulation over class tiles.
    m_prev = m_sc[...]
    m_new = jnp.maximum(m_prev, jnp.max(aug, axis=-1, keepdims=True))
    l_sc[...] = (jnp.exp(m_prev - m_new) * l_sc[...]
                 + jnp.sum(jnp.exp(aug - m_new), axis=-1, keepdims=True))
    m_sc[...] = m_new

    @pl.when(ci == nc - 1)
    def _finalize():
        lse = m_sc[...] + jnp.log(l_sc[...])                        # (tn, 1)
        nll = lse - ylab_ref[...]                                   # (tn, 1)
        w = wn_ref[...]                                             # (tn, 1)
        lane = jax.lax.broadcasted_iota(jnp.int32, out_ref.shape, 1)
        out_ref[...] = jnp.where(lane == 0, w * nll,
                                 jnp.where(lane == 1, w, 0.0))


def _pick_tiles(N, C, A, matmul_itemsize, block_n, block_c,
                vmem_budget=20 * (1 << 20)):
    """Choose MXU-friendly tiles that fit comfortably in scoped VMEM."""
    Ap = _round_up(A, 128)
    if block_n is None:
        block_n = min(128, _round_up(N, 8))
    if block_c is None:
        cp128 = _round_up(C, 128)
        block_c = 128
        for cand in (512, 256, 128):
            bc = min(cand, cp128)
            est = (2 * Ap * bc * matmul_itemsize            # fc^T tile (double buffer)
                   + 2 * 2 * block_n * Ap * matmul_itemsize # cv_l and -2*fc_l*cv_l
                   + 2 * block_n * bc * 4                   # y_s tile
                   + 2 * block_n * 128 * 4                  # output slab
                   + 4 * 2 * block_n * 128 * 4)             # (N,1) row columns (lane-padded)
            if est <= vmem_budget:
                block_c = bc
                break
    return block_n, block_c, Ap


def loss_meta_forward(fc, features_source, y_s, labels_source, ratio, weights, cv,
                      mode="meta", *, block_n=None, block_c=None,
                      matmul_dtype=jnp.float32):
    """Pallas-backed forward of Loss_meta (weighted CE over IDAS-augmented logits)."""
    # TODO(synk): mode == 'update' (EstimatorCV.update_CV state mutation) not implemented.
    del features_source  # values only feed the (unimplemented) covariance update

    f32 = jnp.float32
    fc = fc.astype(f32)
    cv = cv.astype(f32)
    y_s = y_s.astype(f32)
    weights = weights.astype(f32)
    labels = labels_source.astype(jnp.int32)

    C, A = fc.shape
    N = y_s.shape[0]
    assert cv.shape == (C, A) and y_s.shape == (N, C) and weights.shape == (C,)

    block_n, block_c, Ap = _pick_tiles(
        N, C, A, jnp.dtype(matmul_dtype).itemsize, block_n, block_c)

    # --- JAX glue: label gathers (replaces the dense one-hot) -------------------
    fc_l = fc[labels]                                                # (N, A)
    cv_l = cv[labels]                                                # (N, A)
    neg2_fc_cv = -2.0 * fc_l * cv_l                                  # (N, A)
    term3 = jnp.sum(fc_l * fc_l * cv_l, axis=-1, keepdims=True)      # (N, 1)
    y_lab = jnp.take_along_axis(y_s, labels[:, None], axis=1)        # (N, 1)
    w_n = weights[labels][:, None]                                   # (N, 1)
    lab2d = labels[:, None]                                          # (N, 1)

    # --- pad to TPU-friendly tiles (padded classes are masked via y = -1e30,
    #     padded rows get weight 0 so they drop out of num and den) --------------
    Np = _round_up(N, block_n)
    Cp = _round_up(C, block_c)

    fcT = jnp.pad(fc, ((0, Cp - C), (0, Ap - A))).T.astype(matmul_dtype)   # (Ap, Cp)
    cv_l = jnp.pad(cv_l, ((0, Np - N), (0, Ap - A))).astype(matmul_dtype)
    neg2_fc_cv = jnp.pad(neg2_fc_cv, ((0, Np - N), (0, Ap - A))).astype(matmul_dtype)
    y_p = jnp.pad(y_s, ((0, Np - N), (0, Cp - C)), constant_values=_NEG_BIG)
    term3 = jnp.pad(term3, ((0, Np - N), (0, 0)))
    y_lab = jnp.pad(y_lab, ((0, Np - N), (0, 0)))
    w_n = jnp.pad(w_n, ((0, Np - N), (0, 0)))
    lab2d = jnp.pad(lab2d, ((0, Np - N), (0, 0)))

    nn, nc = Np // block_n, Cp // block_c
    kernel = functools.partial(_loss_meta_kernel, ratio=float(ratio), block_c=block_c)
    row_spec = pl.BlockSpec((block_n, 1), lambda ni, ci: (ni, 0))

    partials = pl.pallas_call(
        kernel,
        out_shape=jax.ShapeDtypeStruct((Np, 128), jnp.float32),
        grid_spec=pltpu.PrefetchScalarGridSpec(
            num_scalar_prefetch=0,
            grid=(nn, nc),                       # N tiles (parallel), C tiles (reduction, last)
            in_specs=[
                pl.BlockSpec((block_n, Ap), lambda ni, ci: (ni, 0)),       # cv[labels]
                pl.BlockSpec((block_n, Ap), lambda ni, ci: (ni, 0)),       # -2*fc_l*cv_l
                pl.BlockSpec((Ap, block_c), lambda ni, ci: (0, ci)),       # fc^T tile
                pl.BlockSpec((block_n, block_c), lambda ni, ci: (ni, ci)), # y_s tile
                row_spec,                                                  # term3
                row_spec,                                                  # y_s at label
                row_spec,                                                  # weight at label
                row_spec,                                                  # labels
            ],
            out_specs=pl.BlockSpec((block_n, 128), lambda ni, ci: (ni, 0)),
            scratch_shapes=[pltpu.VMEM((block_n, 1), jnp.float32),   # running max
                            pltpu.VMEM((block_n, 1), jnp.float32)],  # running sum-exp
        ),
        compiler_params=pltpu.CompilerParams(
            dimension_semantics=("parallel", "arbitrary"),
            vmem_limit_bytes=32 * 1024 * 1024),
    )(cv_l, neg2_fc_cv, fcT, y_p, term3, y_lab, w_n, lab2d)

    num = jnp.sum(partials[:, 0])
    den = jnp.sum(partials[:, 1])
    return num / den


def _loss_meta_reference(fc, features_source, y_s, labels_source, ratio, weights, cv):
    """Pure-JAX reference mirroring the PyTorch code, for verification."""
    fc_l = fc[labels_source]                       # (N, A)
    cv_l = cv[labels_source]                       # (N, A)
    diff = fc[None, :, :] - fc_l[:, None, :]       # (N, C, A)
    sigma2 = ratio * jnp.sum(diff * diff * cv_l[:, None, :], axis=2)   # (N, C)
    aug = y_s + 0.5 * sigma2
    logp = jax.nn.log_softmax(aug, axis=-1)
    nll = -jnp.take_along_axis(logp, labels_source[:, None], axis=1)[:, 0]
    w_n = weights[labels_source]
    return jnp.sum(w_n * nll) / jnp.sum(w_n)


if __name__ == "__main__":
    # Small shapes: padded C and A, label gathers exercised.
    N, C, A = 16, 200, 96      # batch, class_num, feature_num
    ratio = 0.5

    key = jax.random.PRNGKey(0)
    k_fc, k_feat, k_y, k_lab, k_w, k_cv = jax.random.split(key, 6)

    fc = jax.random.normal(k_fc, (C, A), dtype=jnp.float32)
    features_source = jax.random.normal(k_feat, (N, A), dtype=jnp.float32)
    y_s = jax.random.normal(k_y, (N, C), dtype=jnp.float32)
    labels_source = jax.random.randint(k_lab, (N,), 0, C, dtype=jnp.int32)
    weights = jax.random.uniform(k_w, (C,), dtype=jnp.float32, minval=0.5, maxval=1.5)
    cv = jax.random.uniform(k_cv, (C, A), dtype=jnp.float32)   # covariance diag >= 0

    ref = _loss_meta_reference(fc, features_source, y_s, labels_source, ratio, weights, cv)

    # 1) adaptive (big-tile) config
    loss_auto = loss_meta_forward(fc, features_source, y_s, labels_source,
                                  ratio, weights, cv)
    loss_auto = jax.block_until_ready(loss_auto)
    assert jnp.allclose(loss_auto, ref, rtol=1e-4, atol=1e-4), (loss_auto, ref)

    # 2) forced small tiles -> exercises the multi-tile grid and online softmax
    loss_tiled = loss_meta_forward(fc, features_source, y_s, labels_source,
                                   ratio, weights, cv, block_n=8, block_c=128)
    loss_tiled = jax.block_until_ready(loss_tiled)
    assert jnp.allclose(loss_tiled, ref, rtol=1e-4, atol=1e-4), (loss_tiled, ref)

    print("KERNEL_OK")
</pallas_src>

<mosaic_0001>
module attributes {stable_mosaic.version = 11 : i64} {
  func.func @_loss_meta_kernel(%arg0: i32, %arg1: i32, %arg2: memref<16x128xf32, #tpu.memory_space<vmem>>, %arg3: memref<16x128xf32, #tpu.memory_space<vmem>>, %arg4: memref<128x256xf32, #tpu.memory_space<vmem>>, %arg5: memref<16x256xf32, #tpu.memory_space<vmem>>, %arg6: memref<16x1xf32, #tpu.memory_space<vmem>>, %arg7: memref<16x1xf32, #tpu.memory_space<vmem>>, %arg8: memref<16x1xf32, #tpu.memory_space<vmem>>, %arg9: memref<16x1xi32, #tpu.memory_space<vmem>>, %arg10: memref<16x128xf32, #tpu.memory_space<vmem>>, %arg11: memref<16x1xf32, #tpu.memory_space<vmem>>, %arg12: memref<16x1xf32, #tpu.memory_space<vmem>>) attributes {dimension_semantics = [#tpu.dimension_semantics<parallel>, #tpu.dimension_semantics<arbitrary>], iteration_bounds = array<i64: 1, 1>, scalar_prefetch = 0 : i64, scratch_operands = 2 : i64, tpu.core_type = #tpu.core_type<tc>, window_params = [{transform_indices = @transform_0, window_bounds = array<i64: 16, 128>}, {transform_indices = @transform_1, window_bounds = array<i64: 16, 128>}, {transform_indices = @transform_2, window_bounds = array<i64: 128, 256>}, {transform_indices = @transform_3, window_bounds = array<i64: 16, 256>}, {transform_indices = @transform_4, window_bounds = array<i64: 16, 1>}, {transform_indices = @transform_5, window_bounds = array<i64: 16, 1>}, {transform_indices = @transform_6, window_bounds = array<i64: 16, 1>}, {transform_indices = @transform_7, window_bounds = array<i64: 16, 1>}, {transform_indices = @transform_8, window_bounds = array<i64: 16, 128>}]} {
    %c0_i32 = arith.constant 0 : i32
    %0 = arith.cmpi eq, %arg1, %c0_i32 : i32
    %1 = arith.extui %0 : i1 to i32
    %c0_i32_0 = arith.constant 0 : i32
    %2 = arith.cmpi ne, %1, %c0_i32_0 : i32
    scf.if %2 {
      %cst_28 = arith.constant 0xFF800000 : f32
      %47 = vector.broadcast %cst_28 : f32 to vector<16x1xf32>
      %c0_29 = arith.constant 0 : index
      %c0_30 = arith.constant 0 : index
      %48 = vector.load %arg11[%c0_29, %c0_30] : memref<16x1xf32, #tpu.memory_space<vmem>>, vector<16x1xf32>
      tpu.vector_store %arg11[%c0_29, %c0_30], %47 {strides = array<i32>} : memref<16x1xf32, #tpu.memory_space<vmem>>, vector<16x1xf32>,
      %cst_31 = arith.constant 0.000000e+00 : f32
      %49 = vector.broadcast %cst_31 : f32 to vector<16x1xf32>
      %c0_32 = arith.constant 0 : index
      %c0_33 = arith.constant 0 : index
      %50 = vector.load %arg12[%c0_32, %c0_33] : memref<16x1xf32, #tpu.memory_space<vmem>>, vector<16x1xf32>
      tpu.vector_store %arg12[%c0_32, %c0_33], %49 {strides = array<i32>} : memref<16x1xf32, #tpu.memory_space<vmem>>, vector<16x1xf32>,
    } else {
    }
    %c0 = arith.constant 0 : index
    %c0_1 = arith.constant 0 : index
    %3 = vector.load %arg4[%c0, %c0_1] : memref<128x256xf32, #tpu.memory_space<vmem>>, vector<128x256xf32>
    %c0_2 = arith.constant 0 : index
    %c0_3 = arith.constant 0 : index
    %4 = vector.load %arg2[%c0_2, %c0_3] : memref<16x128xf32, #tpu.memory_space<vmem>>, vector<16x128xf32>
    %5 = arith.mulf %3, %3 : vector<128x256xf32>
    %cst = arith.constant dense<0.000000e+00> : vector<16x256xf32>
    %6 = tpu.matmul %4, %5, %cst {dimension_numbers = #tpu.dot_dimension_numbers<[1], [0], [0], [1], [0, 0, 1, 1], [], []>} : vector<16x128xf32>, vector<128x256xf32>, vector<16x256xf32> -> vector<16x256xf32>
    %c0_4 = arith.constant 0 : index
    %c0_5 = arith.constant 0 : index
    %7 = vector.load %arg3[%c0_4, %c0_5] : memref<16x128xf32, #tpu.memory_space<vmem>>, vector<16x128xf32>
    %cst_6 = arith.constant dense<0.000000e+00> : vector<16x256xf32>
    %8 = tpu.matmul %7, %3, %cst_6 {dimension_numbers = #tpu.dot_dimension_numbers<[1], [0], [0], [1], [0, 0, 1, 1], [], []>} : vector<16x128xf32>, vector<128x256xf32>, vector<16x256xf32> -> vector<16x256xf32>
    %9 = arith.addf %6, %8 : vector<16x256xf32>
    %c0_7 = arith.constant 0 : index
    %c0_8 = arith.constant 0 : index
    %10 = vector.load %arg6[%c0_7, %c0_8] : memref<16x1xf32, #tpu.memory_space<vmem>>, vector<16x1xf32>
    %11 = vector.broadcast %10 : vector<16x1xf32> to vector<16x256xf32>
    %12 = arith.addf %9, %11 : vector<16x256xf32>
    %cst_9 = arith.constant 5.000000e-01 : f32
    %13 = vector.broadcast %cst_9 : f32 to vector<16x256xf32>
    %14 = arith.mulf %13, %12 : vector<16x256xf32>
    %c256_i32 = arith.constant 256 : i32
    %15 = arith.muli %arg1, %c256_i32 : i32
    %16 = tpu.iota {dimensions = array<i32: 1>} : vector<16x256xi32>
    %17 = vector.broadcast %15 : i32 to vector<16x256xi32>
    %18 = arith.addi %17, %16 : vector<16x256xi32>
    %c0_10 = arith.constant 0 : index
    %c0_11 = arith.constant 0 : index
    %19 = vector.load %arg9[%c0_10, %c0_11] : memref<16x1xi32, #tpu.memory_space<vmem>>, vector<16x1xi32>
    %20 = vector.broadcast %19 : vector<16x1xi32> to vector<16x256xi32>
    %21 = arith.cmpi eq, %18, %20 : vector<16x256xi32>
    %cst_12 = arith.constant 0.000000e+00 : f32
    %22 = vector.broadcast %cst_12 : f32 to vector<16x256xf32>
    %23 = arith.select %21, %22, %14 : vector<16x256xi1>, vector<16x256xf32>
    %c0_13 = arith.constant 0 : index
    %c0_14 = arith.constant 0 : index
    %24 = vector.load %arg5[%c0_13, %c0_14] : memref<16x256xf32, #tpu.memory_space<vmem>>, vector<16x256xf32>
    %cst_15 = arith.constant 5.000000e-01 : f32
    %25 = vector.broadcast %cst_15 : f32 to vector<16x256xf32>
    %26 = arith.mulf %25, %23 : vector<16x256xf32>
    %27 = arith.addf %24, %26 : vector<16x256xf32>
    %c0_16 = arith.constant 0 : index
    %c0_17 = arith.constant 0 : index
    %28 = vector.load %arg11[%c0_16, %c0_17] : memref<16x1xf32, #tpu.memory_space<vmem>>, vector<16x1xf32>
    %cst_18 = arith.constant dense<0xFF800000> : vector<16xf32>
    %29 = vector.multi_reduction <maximumf>, %27, %cst_18 [1] : vector<16x256xf32> to vector<16xf32>
    %30 = vector.shape_cast %29 : vector<16xf32> to vector<16x1xf32>
    %31 = arith.maximumf %28, %30 : vector<16x1xf32>
    %32 = arith.subf %28, %31 : vector<16x1xf32>
    %33 = math.exp %32 : vector<16x1xf32>
    %c0_19 = arith.constant 0 : index
    %c0_20 = arith.constant 0 : index
    %34 = vector.load %arg12[%c0_19, %c0_20] : memref<16x1xf32, #tpu.memory_space<vmem>>, vector<16x1xf32>
    %35 = arith.mulf %33, %34 : vector<16x1xf32>
    %36 = vector.broadcast %31 : vector<16x1xf32> to vector<16x256xf32>
    %37 = arith.subf %27, %36 : vector<16x256xf32>
    %38 = math.exp %37 : vector<16x256xf32>
    %cst_21 = arith.constant dense<0.000000e+00> : vector<16xf32>
    %39 = vector.multi_reduction <add>, %38, %cst_21 [1] : vector<16x256xf32> to vector<16xf32>
    %40 = vector.shape_cast %39 : vector<16xf32> to vector<16x1xf32>
    %41 = arith.addf %35, %40 : vector<16x1xf32>
    %c0_22 = arith.constant 0 : index
    %c0_23 = arith.constant 0 : index
    %42 = vector.load %arg12[%c0_22, %c0_23] : memref<16x1xf32, #tpu.memory_space<vmem>>, vector<16x1xf32>
    tpu.vector_store %arg12[%c0_22, %c0_23], %41 {strides = array<i32>} : memref<16x1xf32, #tpu.memory_space<vmem>>, vector<16x1xf32>,
    %c0_24 = arith.constant 0 : index
    %c0_25 = arith.constant 0 : index
    %43 = vector.load %arg11[%c0_24, %c0_25] : memref<16x1xf32, #tpu.memory_space<vmem>>, vector<16x1xf32>
    tpu.vector_store %arg11[%c0_24, %c0_25], %31 {strides = array<i32>} : memref<16x1xf32, #tpu.memory_space<vmem>>, vector<16x1xf32>,
    %c0_i32_26 = arith.constant 0 : i32
    %44 = arith.cmpi eq, %arg1, %c0_i32_26 : i32
    %45 = arith.extui %44 : i1 to i32
    %c0_i32_27 = arith.constant 0 : i32
    %46 = arith.cmpi ne, %45, %c0_i32_27 : i32
    scf.if %46 {
      %c0_28 = arith.constant 0 : index
      %c0_29 = arith.constant 0 : index
      %47 = vector.load %arg11[%c0_28, %c0_29] : memref<16x1xf32, #tpu.memory_space<vmem>>, vector<16x1xf32>
      %c0_30 = arith.constant 0 : index
      %c0_31 = arith.constant 0 : index
      %48 = vector.load %arg12[%c0_30, %c0_31] : memref<16x1xf32, #tpu.memory_space<vmem>>, vector<16x1xf32>
      %49 = math.log %48 : vector<16x1xf32>
      %50 = arith.addf %47, %49 : vector<16x1xf32>
      %c0_32 = arith.constant 0 : index
      %c0_33 = arith.constant 0 : index
      %51 = vector.load %arg7[%c0_32, %c0_33] : memref<16x1xf32, #tpu.memory_space<vmem>>, vector<16x1xf32>
      %52 = arith.subf %50, %51 : vector<16x1xf32>
      %c0_34 = arith.constant 0 : index
      %c0_35 = arith.constant 0 : index
      %53 = vector.load %arg8[%c0_34, %c0_35] : memref<16x1xf32, #tpu.memory_space<vmem>>, vector<16x1xf32>
      %54 = tpu.iota {dimensions = array<i32: 1>} : vector<16x128xi32>
      %c0_i32_36 = arith.constant 0 : i32
      %55 = vector.broadcast %c0_i32_36 : i32 to vector<16x128xi32>
      %56 = arith.cmpi eq, %54, %55 : vector<16x128xi32>
      %57 = arith.mulf %53, %52 : vector<16x1xf32>
      %c1_i32 = arith.constant 1 : i32
      %58 = vector.broadcast %c1_i32 : i32 to vector<16x128xi32>
      %59 = arith.cmpi eq, %54, %58 : vector<16x128xi32>
      %cst_37 = arith.constant 0.000000e+00 : f32
      %60 = vector.shape_cast %53 : vector<16x1xf32> to vector<16x1xf32>
      %61 = vector.broadcast %60 : vector<16x1xf32> to vector<16x128xf32>
      %62 = vector.broadcast %cst_37 : f32 to vector<16x128xf32>
      %63 = arith.select %59, %61, %62 : vector<16x128xi1>, vector<16x128xf32>
      %64 = vector.shape_cast %57 : vector<16x1xf32> to vector<16x1xf32>
      %65 = vector.broadcast %64 : vector<16x1xf32> to vector<16x128xf32>
      %66 = arith.select %56, %65, %63 : vector<16x128xi1>, vector<16x128xf32>
      %c0_38 = arith.constant 0 : index
      %c0_39 = arith.constant 0 : index
      %67 = vector.load %arg10[%c0_38, %c0_39] : memref<16x128xf32, #tpu.memory_space<vmem>>, vector<16x128xf32>
      tpu.vector_store %arg10[%c0_38, %c0_39], %66 {strides = array<i32>} : memref<16x128xf32, #tpu.memory_space<vmem>>, vector<16x128xf32>,
    } else {
    }
    return
  }
  func.func @transform_0(%arg0: i32, %arg1: i32) -> (i32, i32) {
    %c0_i32 = arith.constant 0 : i32
    %c0_i32_0 = arith.constant 0 : i32
    return %arg0, %c0_i32 : i32, i32
  }
  func.func @transform_1(%arg0: i32, %arg1: i32) -> (i32, i32) {
    %c0_i32 = arith.constant 0 : i32
    %c0_i32_0 = arith.constant 0 : i32
    return %arg0, %c0_i32 : i32, i32
  }
  func.func @transform_2(%arg0: i32, %arg1: i32) -> (i32, i32) {
    %c0_i32 = arith.constant 0 : i32
    %c0_i32_0 = arith.constant 0 : i32
    return %c0_i32, %arg1 : i32, i32
  }
  func.func @transform_3(%arg0: i32, %arg1: i32) -> (i32, i32) {
    %c0_i32 = arith.constant 0 : i32
    return %arg0, %arg1 : i32, i32
  }
  func.func @transform_4(%arg0: i32, %arg1: i32) -> (i32, i32) {
    %c0_i32 = arith.constant 0 : i32
    %c0_i32_0 = arith.constant 0 : i32
    return %arg0, %c0_i32 : i32, i32
  }
  func.func @transform_5(%arg0: i32, %arg1: i32) -> (i32, i32) {
    %c0_i32 = arith.constant 0 : i32
    %c0_i32_0 = arith.constant 0 : i32
    return %arg0, %c0_i32 : i32, i32
  }
  func.func @transform_6(%arg0: i32, %arg1: i32) -> (i32, i32) {
    %c0_i32 = arith.constant 0 : i32
    %c0_i32_0 = arith.constant 0 : i32
    return %arg0, %c0_i32 : i32, i32
  }
  func.func @transform_7(%arg0: i32, %arg1: i32) -> (i32, i32) {
    %c0_i32 = arith.constant 0 : i32
    %c0_i32_0 = arith.constant 0 : i32
    return %arg0, %c0_i32 : i32, i32
  }
  func.func @transform_8(%arg0: i32, %arg1: i32) -> (i32, i32) {
    %c0_i32 = arith.constant 0 : i32
    %c0_i32_0 = arith.constant 0 : i32
    return %arg0, %c0_i32 : i32, i32
  }
}

</mosaic_0001>

<bundles_post_ra>
// kernel: tpu_custom_call.1
= control target key start
LH: loop header
LB: loop body
LE: loop exit
PB: predicated region body
PF: predicated region fallthrough
CT: control target
= control target key end

     0   :  { %13 = vsyncpa [#allocation5], 0  ;;  %s741_s0 = inlined_call_operand.vmem [shape: f32[16,128], index: 0, kind: input, shape index: {}]   ;;  %s742_s1 = inlined_call_operand.vmem [shape: f32[16,128], index: 1, kind: input, shape index: {}]   ;;  %s743_s2 = inlined_call_operand.hbm [shape: f32[128,256], index: 2, kind: input, shape index: {}]   ;;  %s744_s3 = inlined_call_operand.vmem [shape: f32[16,256], index: 3, kind: input, shape index: {}]   ;;  %s745_s4 = inlined_call_operand.vmem [shape: f32[16,1], index: 4, kind: input, shape index: {}]   ;;  %s746_s5 = inlined_call_operand.vmem [shape: f32[16,1], index: 5, kind: input, shape index: {}]   ;;  %s747_s6 = inlined_call_operand.vmem [shape: f32[16,1], index: 6, kind: input, shape index: {}]   ;;  %s748_s7 = inlined_call_operand.vmem [shape: s32[16,1], index: 7, kind: input, shape index: {}]   ;;  %s749_s8 = inlined_call_operand.hbm [shape: f32[16,128], index: 8, kind: output, shape index: {}]  }
   0x1   :  { %14 = vsyncpa [#allocation6], 0  ;;  %s594_s27 = smov [#allocation4]   ;;  %s546_s9 = scalar_lea.hbm %s743_s2, 4096 }
   0x2   :  { %s24_s28 = sshll.u32 %s594_s27, 4  ;;  %p547_p0 = scmp.ne.s32.totalorder %s743_s2, %s546_s9  ;;  %s25_s28 = int_to_ptr.vmem [resolvable:$true] %s24_s28 }
   0x3   :  { %p550_p1 = scmp.lt.u32.totalorder %s546_s9, %s743_s2 }
   0x5   :  { %p552_p2 = pnand %p550_p1, %p547_p0 }
   0x7   :  { %555 = shalt.err (!%p552_p2)
}
   0x8   :  { %s556_s14 = scalar_lea.vmem %s25_s28, 4096  ;;  %p561_p4 = scmp.lt.s32.totalorder %s25_s28, %s25_s28 }
   0x9   :  { %p557_p3 = scmp.ne.s32.totalorder %s25_s28, %s556_s14  ;;  %p562_p5 = scmp.lt.s32.totalorder %s556_s14, %s556_s14 }
   0xb   :  { %p563_p6 = por %p562_p5, %p561_p4 }
   0xd   :  { %p564_p7 = pnand %p563_p6, %p557_p3 }
   0xf   :  { %567 = shalt.err (!%p564_p7)
}
  0x10   :  { %s595_s15 = smov 256   ;;  %s596_s16 = smov 16  }
  0x11   :  { %30 = dma.hbm_to_vmem [thread:$0]  %s743_s2, 4096, %s25_s28, [#allocation5], %s595_s15, %s595_s15, %s596_s16  }
  0x12   :  { %590 = dma.done.wait [#allocation5], 4096  }
  0x13   :  { %591 = vsyncadd [#allocation5], 4294963200  ;;  %v597_v0 = vmov 0.0   ;;  %v598_v1 = vmov 0   ;;  %v54_v2 = vld [vmem:[#allocation4 + $0x8] sm:$0xff]  ;;  %v56_v3 = vld [vmem:[#allocation4 + $0x18] sm:$0xff] }
  0x14   :  { %185 = vmatprep.mubr.f32.mxu1 %v597_v0  ;;  %262 = vmatprep.mubr.f32.mxu0 %v597_v0  ;;  %v53_v4 = vld [vmem:[#allocation4] sm:$0xff]  ;;  %v451_v5 = vpack.c.bf16 %v56_v3, %v54_v2  ;;  %v55_v6 = vld [vmem:[#allocation4 + $0x10] sm:$0xff]  ;;  %v88_v7 = vmul.f32 %v54_v2, %v54_v2  ;;  %v90_v8 = vmul.f32 %v56_v3, %v56_v3  ;;  %v58_v10 = vld [vmem:[#allocation4 + $0x28] sm:$0xff]  ;;  %vm48_vm0 = vcmask 7168   ;;  %s600_s21 = smov [#allocation7]  }
  0x15   :  { %528 = vset.pattern.permute.xlu0 %v598_v1  ;;  %529 = vset.pattern.permute.xlu1 %v598_v1  ;;  %v87_v9 = vmul.f32 %v53_v4, %v53_v4  ;;  %v60_v11 = vld [vmem:[#allocation4 + $0x38] sm:$0xff]  ;;  %v453_v12 = vpack.c.bf16 %v55_v6, %v53_v4  ;;  %v89_v13 = vmul.f32 %v55_v6, %v55_v6  ;;  %v57_v15 = vld [vmem:[#allocation4 + $0x20] sm:$0xff]  ;;  %v59_v16 = vld [vmem:[#allocation4 + $0x30] sm:$0xff]  ;;  %s439_s22 = sshll.u32 %s600_s21, 4  ;;  %s440_s22 = int_to_ptr.vmem [resolvable:$true] %s439_s22 }
  0x16   :  { %v455_v14 = vpack.c.bf16 %v60_v11, %v58_v10  ;;  %v92_v17 = vmul.f32 %v58_v10, %v58_v10  ;;  %v62_v18 = vld [vmem:[#allocation4 + $0x48] sm:$0xff]  ;;  %452 = vmatprep.subr.bf16.mxu1 %v451_v5  ;;  %v483_v19 = vpack.c.bf16 %v90_v8, %v88_v7  ;;  %v94_v20 = vmul.f32 %v60_v11, %v60_v11  ;;  %v64_v22 = vld [vmem:[#allocation4 + $0x58] sm:$0xff]  ;;  %v61_v23 = vld [vmem:[#allocation4 + $0x40] sm:$0xff]  ;;  %p573_p9 = scmp.lt.s32.totalorder %s440_s22, %s440_s22 }
  0x17   :  { %v91_v21 = vmul.f32 %v57_v15, %v57_v15  ;;  %v63_v24 = vld [vmem:[#allocation4 + $0x50] sm:$0xff]  ;;  %454 = vmatpush1.bf16.msra.mxu1 %v453_v12  ;;  %v485_v25 = vpack.c.bf16 %v89_v13, %v87_v9  ;;  %v457_v26 = vpack.c.bf16 %v59_v16, %v57_v15  ;;  %v93_v27 = vmul.f32 %v59_v16, %v59_v16  ;;  %v66_v29 = vld [vmem:[#allocation4 + $0x68] sm:$0xff]  ;;  %v68_v30 = vld [vmem:[#allocation4 + $0x78] sm:$0xff] }
  0x18   :  { %v459_v28 = vpack.c.bf16 %v64_v22, %v62_v18  ;;  %484 = vmatprep.subr.bf16.mxu0 %v483_v19  ;;  %456 = vmatprep.subr.bf16.mxu1 %v455_v14  ;;  %v487_v31 = vpack.c.bf16 %v94_v20, %v92_v17  ;;  %v96_v32 = vmul.f32 %v62_v18, %v62_v18  ;;  %v65_v38 = vld [vmem:[#allocation4 + $0x60] sm:$0xff]  ;;  %v67_v39 = vld [vmem:[#allocation4 + $0x70] sm:$0xff]  ;;  %v70_v43 = vld [vmem:[#allocation4 + $0x88] sm:$0xff] }
  0x19   :  { %v98_v33 = vmul.f32 %v64_v22, %v64_v22  ;;  %486 = vmatpush1.bf16.msra.mxu0 %v485_v25  ;;  %v489_v34 = vpack.c.bf16 %v93_v27, %v91_v21  ;;  %v95_v35 = vmul.f32 %v61_v23, %v61_v23  ;;  %v97_v36 = vmul.f32 %v63_v24, %v63_v24  ;;  %v72_v44 = vld [vmem:[#allocation4 + $0x98] sm:$0xff]  ;;  %v69_v50 = vld [vmem:[#allocation4 + $0x80] sm:$0xff]  ;;  %v71_v51 = vld [vmem:[#allocation4 + $0x90] sm:$0xff] }
  0x1a   :  { %488 = vmatprep.subr.bf16.mxu0 %v487_v31  ;;  %v100_v40 = vmul.f32 %v66_v29, %v66_v29  ;;  %v102_v41 = vmul.f32 %v68_v30, %v68_v30  ;;  %v461_v42 = vpack.c.bf16 %v63_v24, %v61_v23  ;;  %v463_v45 = vpack.c.bf16 %v68_v30, %v66_v29  ;;  %v74_v55 = vld [vmem:[#allocation4 + $0xa8] sm:$0xff]  ;;  %v76_v56 = vld [vmem:[#allocation4 + $0xb8] sm:$0xff]  ;;  %v275_v58 = vld [vmem:[%s745_s4] sm:$0xff] }
  0x1b   :  { %v491_v37 = vpack.c.bf16 %v98_v33, %v96_v32  ;;  %458 = vmatpush1.bf16.msra.mxu1 %v457_v26  ;;  %v493_v46 = vpack.c.bf16 %v97_v36, %v95_v35  ;;  %v99_v47 = vmul.f32 %v65_v38, %v65_v38  ;;  %v101_v48 = vmul.f32 %v67_v39, %v67_v39  ;;  %v302_v62 = vld [vmem:[%s748_s7] sm:$0xff]  ;;  %v75_v2 = vld [vmem:[#allocation4 + $0xb0] sm:$0xff]  ;;  %v78_v6 = vld [vmem:[#allocation4 + $0xc8] sm:$0xff] }
  0x1c   :  { %460 = vmatprep.subr.bf16.mxu1 %v459_v28  ;;  %v495_v49 = vpack.c.bf16 %v102_v41, %v100_v40  ;;  %v104_v52 = vmul.f32 %v70_v43, %v70_v43  ;;  %v106_v53 = vmul.f32 %v72_v44, %v72_v44  ;;  %v465_v54 = vpack.c.bf16 %v67_v39, %v65_v38  ;;  %v73_v1 = vld [vmem:[#allocation4 + $0xa0] sm:$0xff]  ;;  %v80_v7 = vld [vmem:[#allocation4 + $0xd8] sm:$0xff]  ;;  %v276_v9 = vld [vmem:[%s745_s4 + $0x8] sm:$0xff] }
  0x1d   :  { %490 = vmatpush1.bf16.msra.mxu0 %v489_v34  ;;  %v467_v57 = vpack.c.bf16 %v72_v44, %v70_v43  ;;  %v497_v59 = vpack.c.bf16 %v101_v48, %v99_v47  ;;  %v103_v60 = vmul.f32 %v69_v50, %v69_v50  ;;  %v105_v61 = vmul.f32 %v71_v51, %v71_v51  ;;  %v303_v13 = vld [vmem:[%s748_s7 + $0x8] sm:$0xff]  ;;  %v77_v15 = vld [vmem:[#allocation4 + $0xc0] sm:$0xff]  ;;  %v79_v16 = vld [vmem:[#allocation4 + $0xd0] sm:$0xff] }
  0x1e   :  { %492 = vmatprep.subr.bf16.mxu0 %v491_v37  ;;  %v499_v63 = vpack.c.bf16 %v106_v53, %v104_v52  ;;  %v108_v3 = vmul.f32 %v74_v55, %v74_v55  ;;  %v110_v4 = vmul.f32 %v76_v56, %v76_v56  ;;  %v469_v5 = vpack.c.bf16 %v71_v51, %v69_v50  ;;  %v82_v20 = vld [vmem:[#allocation4 + $0xe8] sm:$0xff]  ;;  %v84_v21 = vld [vmem:[#allocation4 + $0xf8] sm:$0xff]  ;;  %v81_v27 = vld [vmem:[#allocation4 + $0xe0] sm:$0xff] }
  0x1f   :  { %462 = vmatpush1.bf16.msra.mxu1 %v461_v42  ;;  %279 = vperm.xlu0 %528, %v275_v58   ;;  %v471_v8 = vpack.c.bf16 %v76_v56, %v74_v55  ;;  %v501_v10 = vpack.c.bf16 %v105_v61, %v103_v60  ;;  %v107_v11 = vmul.f32 %v73_v1, %v73_v1  ;;  %v83_v28 = vld [vmem:[#allocation4 + $0xf0] sm:$0xff]  ;;  %v119_v39 = vld [vmem:[%s742_s1] sm:$0xff]  ;;  %v120_v41 = vld [vmem:[%s742_s1 + $0x8] sm:$0xff]  ;;  %v599_v43 = vmov -inf  }
  0x20   :  { %464 = vmatprep.subr.bf16.mxu1 %v463_v45  ;;  %305 = vperm.xlu1 %529, %v302_v62   ;;  %v109_v12 = vmul.f32 %v75_v2, %v75_v2  ;;  %v503_v14 = vpack.c.bf16 %v110_v4, %v108_v3  ;;  %v112_v17 = vmul.f32 %v78_v6, %v78_v6  ;;  %v85_v40 = vld [vmem:[%s741_s0] sm:$0xff]  ;;  %v86_v42 = vld [vmem:[%s741_s0 + $0x8] sm:$0xff]  ;;  %v296_v44 = vlaneseq }
  0x21   :  { %494 = vmatpush1.bf16.msra.mxu0 %v493_v46  ;;  %v114_v18 = vmul.f32 %v80_v7, %v80_v7  ;;  %v473_v19 = vpack.c.bf16 %v75_v2, %v73_v1  ;;  %v475_v22 = vpack.c.bf16 %v80_v7, %v78_v6  ;;  %v111_v24 = vmul.f32 %v77_v15, %v77_v15 }
  0x22   :  { %496 = vmatprep.subr.bf16.mxu0 %v495_v49  ;;  %v505_v23 = vpack.c.bf16 %v109_v12, %v107_v11  ;;  %v113_v25 = vmul.f32 %v79_v16, %v79_v16  ;;  %v116_v29 = vmul.f32 %v82_v20, %v82_v20  ;;  %v118_v30 = vmul.f32 %v84_v21, %v84_v21 }
  0x23   :  { %466 = vmatpush1.bf16.msra.mxu1 %v465_v54  ;;  %284 = vperm.xlu0 %528, %v276_v9   ;;  %v507_v26 = vpack.c.bf16 %v114_v18, %v112_v17  ;;  %v477_v31 = vpack.c.bf16 %v79_v16, %v77_v15  ;;  %v479_v32 = vpack.c.bf16 %v84_v21, %v82_v20  ;;  %v694_v45 = vand.u32 127, %v296_v44  ;;  %v319_v9 = vld [vmem:[%s744_s3 + $0x8] sm:$0xff]  ;;  %v320_v16 = vld [vmem:[%s744_s3 + $0x10] sm:$0xff] }
  0x24   :  { %468 = vmatprep.subr.bf16.mxu1 %v467_v57  ;;  %308 = vperm.xlu1 %529, %v303_v13   ;;  %v509_v33 = vpack.c.bf16 %v113_v25, %v111_v24  ;;  %v115_v34 = vmul.f32 %v81_v27, %v81_v27  ;;  %v117_v35 = vmul.f32 %v83_v28, %v83_v28 }
  0x25   :  { %498 = vmatpush1.bf16.msra.mxu0 %v497_v59  ;;  %v511_v36 = vpack.c.bf16 %v118_v30, %v116_v29  ;;  %v481_v37 = vpack.c.bf16 %v83_v28, %v81_v27  ;;  %49 = vst.msk [vmem:[#allocation2] sm:$0xff] %vm48_vm0, %v599_v43  ;;  %50 = vst.msk [vmem:[#allocation2 + $0x8] sm:$0xff] %vm48_vm0, %v599_v43  ;;  %v298_v52 = vadd.s32 128, %v694_v45  ;;  %vm407_vm5 = vcmp.eq.s32.totalorder %v694_v45, 1 }
  0x26   :  { %500 = vmatprep.subr.bf16.mxu0 %v499_v63  ;;  %v513_v38 = vpack.c.bf16 %v117_v35, %v115_v34  ;;  %51 = vst.msk [vmem:[#allocation3] sm:$0xff] %vm48_vm0, %v597_v0  ;;  %52 = vst.msk [vmem:[#allocation3 + $0x8] sm:$0xff] %vm48_vm0, %v597_v0  ;;  %vm404_vm6 = vcmp.eq.s32.totalorder %v694_v45, 0 }
  0x27   :  { %470 = vmatpush1.bf16.msra.mxu1 %v469_v5  ;;  %v318_v5 = vld [vmem:[%s744_s3] sm:$0xff] }
  0x28   :  { %472 = vmatprep.subr.bf16.mxu1 %v471_v8 }
  0x29   :  { %502 = vmatpush1.bf16.msra.mxu0 %v501_v10 }
  0x2a   :  { %504 = vmatprep.subr.bf16.mxu0 %v503_v14 }
  0x2b   :  { %474 = vmatpush1.bf16.msra.mxu1 %v473_v19  ;;  %v321_v19 = vld [vmem:[%s744_s3 + $0x18] sm:$0xff] }
  0x2c   :  { %476 = vmatprep.subr.bf16.mxu1 %v475_v22  ;;  %v330_v25 = vld [vmem:[#allocation2] sm:$0xff]  ;;  %v331_v28 = vld [vmem:[#allocation2 + $0x8] sm:$0xff] }
  0x2d   :  { %506 = vmatpush1.bf16.msra.mxu0 %v505_v23 }
  0x2e   :  { %508 = vmatprep.subr.bf16.mxu0 %v507_v26 }
  0x2f   :  { %478 = vmatpush1.bf16.msra.mxu1 %v477_v31 }
  0x30   :  { %480 = vmatprep.subr.bf16.mxu1 %v479_v32 }
  0x31   :  { %510 = vmatpush1.bf16.msra.mxu0 %v509_v33 }
  0x32   :  { %512 = vmatprep.subr.bf16.mxu0 %v511_v36 }
  0x33   :  { %482 = vmatpush1.bf16.msra.mxu1 %v481_v37 }
  0x35   :  { %514 = vmatpush1.bf16.msra.mxu0 %v513_v38 }
  0x36   :  { %186 = vmatmul.mubr.f32.vlgmr.msra.gmra.mrb[0].mxu1 %v119_v39 }
  0x37   :  { %191 = vmatprep.mubr.f32.mxu1 %v597_v0 }
  0x38   :  { %263 = vmatmul.mubr.f32.vlgmr.msra.gmra.mrb[0].mxu0 %v85_v40 }
  0x39   :  { %268 = vmatprep.mubr.f32.mxu0 %v597_v0 }
  0x3a   :  { %192 = vmatmul.mubr.f32.gmra.mrb[2].mxu1 %v120_v41 }
  0x3c   :  { %269 = vmatmul.mubr.f32.gmra.mrb[2].mxu0 %v86_v42 }
  0x9e   :  { %v280_v48 = vpop.permute.xlu0 %279 }
  0x9f   :  { %v306_v53 = vpop.permute.xlu1 %305 }
  0xa0   :  { %vm310_vm1 = vcmp.eq.s32.totalorder %v694_v45, %v306_v53  ;;  %vm311_vm2 = vcmp.eq.s32.totalorder %v298_v52, %v306_v53 }
  0xa2   :  { %v285_v63 = vpop.permute.xlu0 %284 }
  0xa3   :  { %v309_v4 = vpop.permute.xlu1 %308 }
  0xa4   :  { %vm312_vm3 = vcmp.eq.s32.totalorder %v694_v45, %v309_v4  ;;  %vm313_vm4 = vcmp.eq.s32.totalorder %v298_v52, %v309_v4 }
 0x109   :  { %v187_v46 = vpop.f32.mrb[0].mxu1 }
 0x10a   :  { %v189_v47 = vpop.f32.mrb[1].mxu1 }
 0x10b   :  { %v264_v49 = vpop.f32.mrb[0].mxu0 }
 0x10c   :  { %v265_v50 = vadd.f32 %v264_v49, %v187_v46  ;;  %v266_v51 = vpop.f32.mrb[1].mxu0 }
 0x10d   :  { %v267_v54 = vadd.f32 %v266_v51, %v189_v47  ;;  %v193_v55 = vpop.f32.mrb[2].mxu1  ;;  %v402_v51 = vld [vmem:[%s747_s6] sm:$0xff] }
 0x10e   :  { %v287_v56 = vadd.f32 %v280_v48, %v265_v50  ;;  %v195_v57 = vpop.f32.mrb[3].mxu1  ;;  %v403_v50 = vld [vmem:[%s747_s6 + $0x8] sm:$0xff] }
 0x10f   :  { %v288_v58 = vadd.f32 %v280_v48, %v267_v54  ;;  %v270_v0 = vpop.f32.mrb[2].mxu0 }
 0x110   :  { %v291_v59 = vmul.f32 0.5, %v287_v56  ;;  %v271_v60 = vadd.f32 %v270_v0, %v193_v55  ;;  %v272_v61 = vpop.f32.mrb[3].mxu0  ;;  %v346_v55 = vld [vmem:[#allocation3] sm:$0xff]  ;;  %v347_v0 = vld [vmem:[#allocation3 + $0x8] sm:$0xff] }
 0x111   :  { %v292_v62 = vmul.f32 0.5, %v288_v58  ;;  %v273_v1 = vadd.f32 %v272_v61, %v195_v57 }
 0x112   :  { %v314_v2 = vsel %vm310_vm1, 0.0, %v291_v59  ;;  %v289_v3 = vadd.f32 %v285_v63, %v271_v60 }
 0x113   :  { %v315_v6 = vsel %vm311_vm2, 0.0, %v292_v62  ;;  %v322_v7 = vmul.f32 0.5, %v314_v2  ;;  %v290_v8 = vadd.f32 %v285_v63, %v273_v1 }
 0x114   :  { %v323_v10 = vmul.f32 0.5, %v315_v6  ;;  %v293_v11 = vmul.f32 0.5, %v289_v3 }
 0x115   :  { %v294_v12 = vmul.f32 0.5, %v290_v8  ;;  %v326_v13 = vadd.f32 %v322_v7, %v318_v5  ;;  %v398_v5 = vld [vmem:[%s746_s5] sm:$0xff] }
 0x116   :  { %v316_v14 = vsel %vm312_vm3, 0.0, %v293_v11  ;;  %v327_v15 = vadd.f32 %v323_v10, %v319_v9  ;;  %v399_v11 = vld [vmem:[%s746_s5 + $0x8] sm:$0xff]  ;;  %s568_s5 = scalar_lea.vmem %s440_s22, 256 }
 0x117   :  { %v317_v17 = vsel %vm313_vm4, 0.0, %v294_v12  ;;  %v324_v18 = vmul.f32 0.5, %v316_v14  ;;  %p569_p8 = scmp.ne.s32.totalorder %s440_s22, %s568_s5  ;;  %p574_p10 = scmp.lt.s32.totalorder %s568_s5, %s568_s5 }
 0x118   :  { %v325_v20 = vmul.f32 0.5, %v317_v17  ;;  %v332_v21 = vmax.f32 %v326_v13, %v327_v15 }
 0x119   :  { %v328_v22 = vadd.f32 %v324_v18, %v320_v16  ;;  %p575_p11 = por %p574_p10, %p573_p9 }
 0x11a   :  { %333 = vmax.xlane.f32.xlu0 %v332_v21  ;;  %v329_v23 = vadd.f32 %v325_v20, %v321_v19 }
 0x11b   :  { %p576_p12 = pnand %p575_p11, %p569_p8 }
 0x11c   :  { %v335_v24 = vmax.f32 %v328_v22, %v329_v23 }
 0x11e   :  { %336 = vmax.xlane.f32.xlu1 %v335_v24 }
 0x1a7   :  { %v334_v26 = vpop.xlane.xlu0 %333 }
 0x1a8   :  { %v338_v27 = vmax.f32 %v330_v25, %v334_v26 }
 0x1aa   :  { %v340_v29 = vsub.f32 %v330_v25, %v338_v27  ;;  %383 = vst.msk [vmem:[#allocation2] sm:$0xff] %vm48_vm0, %v338_v27  ;;  %352 = vperm.xlu0 %528, %v338_v27  }
 0x1ab   :  { %v337_v30 = vpop.xlane.xlu1 %336 }
 0x1ac   :  { %v339_v31 = vmax.f32 %v331_v28, %v337_v30  ;;  %v342_v52 = vmul.f32 1.442695, %v340_v29 }
 0x1ae   :  { %v341_v32 = vsub.f32 %v331_v28, %v339_v31  ;;  %384 = vst.msk [vmem:[#allocation2 + $0x8] sm:$0xff] %vm48_vm0, %v339_v31  ;;  %357 = vperm.xlu1 %529, %v339_v31  }
 0x1b0   :  { %v344_v53 = vmul.f32 1.442695, %v341_v32 }
 0x1b1   :  { %v388_v4 = vld [vmem:[#allocation2] sm:$0xff] }
 0x1b5   :  { %v389_v10 = vld [vmem:[#allocation2 + $0x8] sm:$0xff] }
 0x229   :  { %v353_v33 = vpop.permute.xlu0 %352 }
 0x22a   :  { %v360_v34 = vsub.f32 %v326_v13, %v353_v33  ;;  %v361_v35 = vsub.f32 %v327_v15, %v353_v33 }
 0x22c   :  { %v364_v36 = vmul.f32 1.442695, %v360_v34  ;;  %v366_v37 = vmul.f32 1.442695, %v361_v35 }
 0x22d   :  { %v358_v38 = vpop.permute.xlu1 %357 }
 0x22e   :  { %530 = vpow2.f32 %v364_v36  ;;  %v362_v39 = vsub.f32 %v328_v22, %v358_v38  ;;  %v363_v40 = vsub.f32 %v329_v23, %v358_v38 }
 0x22f   :  { %532 = vpow2.f32 %v366_v37 }
 0x230   :  { %v368_v41 = vmul.f32 1.442695, %v362_v39  ;;  %v370_v42 = vmul.f32 1.442695, %v363_v40 }
 0x232   :  { %534 = vpow2.f32 %v368_v41 }
 0x233   :  { %536 = vpow2.f32 %v370_v42 }
 0x234   :  { %538 = vpow2.f32 %v342_v52 }
 0x235   :  { %540 = vpow2.f32 %v344_v53 }
 0x238   :  { %v531_v43 = vpop.eup %530 }
 0x239   :  { %v533_v44 = vpop.eup %532 }
 0x23a   :  { %v372_v46 = vadd.f32 %v533_v44, %v531_v43 }
 0x23c   :  { %v535_v47 = vpop.eup %534  ;;  %373 = vadd.xlane.f32.xlu0 %v372_v46 }
 0x23d   :  { %v537_v48 = vpop.eup %536 }
 0x23e   :  { %v375_v49 = vadd.f32 %v537_v48, %v535_v47  ;;  %v539_v54 = vpop.eup %538 }
 0x23f   :  { %v348_v56 = vmul.f32 %v539_v54, %v346_v55  ;;  %v541_v57 = vpop.eup %540 }
 0x240   :  { %376 = vadd.xlane.f32.xlu1 %v375_v49  ;;  %v349_v60 = vmul.f32 %v541_v57, %v347_v0 }
 0x251   :  { %415 = vperm.xlu1 %529, %v403_v50  }
 0x252   :  { %410 = vperm.xlu0 %528, %v402_v51  }
 0x2c9   :  { %v374_v58 = vpop.xlane.xlu0 %373 }
 0x2ca   :  { %v378_v59 = vadd.f32 %v374_v58, %v348_v56 }
 0x2cc   :  { %381 = vst.msk [vmem:[#allocation3] sm:$0xff] %vm48_vm0, %v378_v59 }
 0x2cd   :  { %v377_v61 = vpop.xlane.xlu1 %376 }
 0x2ce   :  { %v379_v62 = vadd.f32 %v377_v61, %v349_v60 }
 0x2d0   :  { %382 = vst.msk [vmem:[#allocation3 + $0x8] sm:$0xff] %vm48_vm0, %v379_v62 }
 0x2d1   :  { %v411_v16 = vpop.permute.xlu0 %410  ;;  %v416_v17 = vpop.permute.xlu1 %415 }
 0x2d2   :  { %v418_v18 = vsel %vm407_vm5, %v411_v16, 0.0  ;;  %v419_v21 = vsel %vm407_vm5, %v416_v17, 0.0 }
 0x2d3   :  { %v390_v63 = vld [vmem:[#allocation3] sm:$0xff] }
 0x2d4   :  { %542 = vlog2.f32 %v390_v63 }
 0x2d7   :  { %v391_v1 = vld [vmem:[#allocation3 + $0x8] sm:$0xff] }
 0x2d8   :  { %544 = vlog2.f32 %v391_v1 }
 0x2de   :  { %v543_v2 = vpop.eup %542 }
 0x2df   :  { %v393_v3 = vmul.f32 0.6931472, %v543_v2 }
 0x2e1   :  { %v396_v6 = vadd.f32 %v393_v3, %v388_v4 }
 0x2e2   :  { %v545_v7 = vpop.eup %544 }
 0x2e3   :  { %v400_v8 = vsub.f32 %v396_v6, %v398_v5  ;;  %v395_v9 = vmul.f32 0.6931472, %v545_v7 }
 0x2e5   :  { %v405_v12 = vmul.f32 %v402_v51, %v400_v8  ;;  %v397_v13 = vadd.f32 %v395_v9, %v389_v10 }
 0x2e7   :  { %422 = vperm.xlu0 %528, %v405_v12   ;;  %v401_v14 = vsub.f32 %v397_v13, %v399_v11 }
 0x2e9   :  { %v406_v15 = vmul.f32 %v403_v50, %v401_v14 }
 0x2eb   :  { %427 = vperm.xlu1 %529, %v406_v15  }
 0x366   :  { %v423_v19 = vpop.permute.xlu0 %422 }
 0x367   :  { %v430_v20 = vsel %vm404_vm6, %v423_v19, %v418_v18 }
 0x368   :  { %432 = vst [vmem:[#allocation7] sm:$0xff] %v430_v20 }
 0x36a   :  { %v428_v22 = vpop.permute.xlu1 %427 }
 0x36b   :  { %v431_v23 = vsel %vm404_vm6, %v428_v22, %v419_v21 }
 0x36c   :  { %433 = vst [vmem:[#allocation7 + $0x8] sm:$0xff] %v431_v23 }
 0x36d   :  { %579 = shalt.err (!%p576_p12)
}
 0x36e   :  { %s580_s25 = scalar_lea.hbm %s749_s8, 256 }
 0x36f   :  { %p581_p13 = scmp.ne.s32.totalorder %s749_s8, %s580_s25  ;;  %p584_p0 = scmp.lt.u32.totalorder %s580_s25, %s749_s8 }
 0x371   :  { %p586_p1 = pnand %p584_p0, %p581_p13 }
 0x373   :  { %589 = shalt.err (!%p586_p1)
}
 0x374   :  { %s601_s28 = smov 128   ;;  %s602_s29 = smov 8  }
 0x375   :  { %445 = dma.vmem_to_hbm [thread:$0]  %s440_s22, 256, %s749_s8, [#allocation6], %s601_s28, %s601_s28, %s602_s29  }
 0x376   :  { %592 = dma.done.wait [#allocation6], 256  }
 0x377   :  { %593 = vsyncadd [#allocation6], 4294967040 }
 0x378   :  { %449 = vsyncpa [#allocation5], 1 }
 0x379   :  { %450 = vsyncpa [#allocation6], 1 }

</bundles_post_ra>
